<compile_context>
chip_gen: v6e
topology: v6e:2x2x1
jax: 0.10.0
libtpu: 0.0.40
codegen_flags: <defaults>
</compile_context>

<pallas_src>
from functools import partial

import jax
import jax.numpy as jnp
from jax.experimental import pallas as pl
from jax.experimental.pallas import tpu as pltpu


def _patch_merging_kernel(x_ref, aux_ref, w_ref, o_ref, *, eps):
    # x_ref:   (TH, 2, W2, 2C)  native dtype; [:,0]=[x0|x2], [:,1]=[x1|x3]
    # aux_ref: (2, Cout) f32;   row 0 = colsum(Wg), row 1 = beta_perm @ Wt_perm
    # w_ref:   (2, 2C, Cout)    gamma-folded weight halves, in x.dtype
    # o_ref:   (TH*W2, Cout)
    th, _, w2, c2 = x_ref.shape
    m = th * w2
    inv_n = 1.0 / (2.0 * c2)                      # 1 / (4*dim)

    xe = x_ref[:, 0, :, :].reshape(m, c2)         # native dtype, [x0|x2]
    xo = x_ref[:, 1, :, :].reshape(m, c2)         # native dtype, [x1|x3]

    # Joint LayerNorm statistics over the 4C vector, single pass, f32.
    xe_f = xe.astype(jnp.float32)
    xo_f = xo.astype(jnp.float32)
    s1 = (jnp.sum(xe_f, axis=-1, keepdims=True)
          + jnp.sum(xo_f, axis=-1, keepdims=True))
    s2 = (jnp.sum(xe_f * xe_f, axis=-1, keepdims=True)
          + jnp.sum(xo_f * xo_f, axis=-1, keepdims=True))
    mean = s1 * inv_n                             # (m, 1)
    var = jnp.maximum(s2 * inv_n - mean * mean, 0.0)
    rstd = jax.lax.rsqrt(var + eps)               # EUP, essentially free

    # (4C -> Cout) reduction as two (2C x Cout) MXU matmuls, operands in the
    # activation dtype, f32 accumulation.
    acc = jnp.dot(xe, w_ref[0], preferred_element_type=jnp.float32)
    acc = acc + jnp.dot(xo, w_ref[1], preferred_element_type=jnp.float32)

    # Epilogue on the half-width (m, Cout) tile: undo the un-centered matmul,
    # apply the per-row inverse std and the folded bias.
    wsum = aux_ref[0:1, :]                        # (1, Cout) f32
    bias = aux_ref[1:2, :]                        # (1, Cout) f32
    out = rstd * (acc - mean * wsum) + bias
    o_ref[...] = out.astype(o_ref.dtype)


def _per_token_vmem_bytes(c, itemsize):
    """VMEM bytes of working set per merged token (output row)."""
    cout = 2 * c
    return (4 * c * itemsize * 2      # input halves (4C/token), double-buffered
            + cout * itemsize * 2     # output row, double-buffered
            + 4 * c * 4               # f32 statistics temporaries
            + 4 * c * itemsize        # possible in-kernel relayout copies
            + cout * 4 * 2)           # f32 accumulator + epilogue temporary


def _fixed_vmem_bytes(c, itemsize):
    """Grid-invariant VMEM: parameter blocks (+ compiler headroom)."""
    cout = 2 * c
    return (2 * (2 * c) * cout * itemsize * 2   # gamma-folded weight, 2 buffers
            + 2 * cout * 4 * 2                  # aux (wsum, bias) f32
            + (2 << 20))                        # compiler-internal headroom


def _pick_row_tile(bh2, w2, c, itemsize, *, vmem_budget=24 << 20, min_steps=4):
    """Pick TH = token-rows per grid step.

    * TH divides BH2 (no partial blocks).
    * (TH * W2) aligned to the sublane tile so output stores are unmasked
      (unless TH == BH2, a full-extent block, which is always layout-legal).
    * Working set (double-buffered IO + f32 temps + params) fits `vmem_budget`.
    * At least `min_steps` grid steps when possible, so the BlockSpec pipeline
      overlaps DMA with compute and v7x's two TensorCores each get >= 2 steps.
    """
    per_token = _per_token_vmem_bytes(c, itemsize)
    fixed = _fixed_vmem_bytes(c, itemsize)
    avail = max(vmem_budget - fixed, per_token * w2)
    th_budget = max(1, int(avail // (per_token * w2)))

    sub = 8 if itemsize >= 4 else (16 if itemsize == 2 else 32)
    divisors = [d for d in range(1, bh2 + 1) if bh2 % d == 0]

    def ok(th, need_steps, need_align):
        if th > th_budget:
            return False
        if need_steps and bh2 // th < min(min_steps, bh2):
            return False
        if need_align and (th * w2) % sub != 0:
            return False
        return True

    for need_steps, need_align in ((True, True), (False, True)):
        cand = [d for d in divisors if ok(d, need_steps, need_align)]
        if cand:
            return max(cand)
    if bh2 <= th_budget:            # full-extent block: always layout-legal
        return bh2
    cand = [d for d in divisors if d <= th_budget]
    return max(cand) if cand else 1


def patch_merging_pallas(x, H, W, gamma, beta, w_red, *, eps=1e-5):
    """PatchMerging forward.

    x:      (B, H*W, C)
    gamma:  (4C,)    LayerNorm weight
    beta:   (4C,)    LayerNorm bias
    w_red:  (2C, 4C) nn.Linear(4C, 2C, bias=False).weight   (out, in)
    returns (B, (H//2)*(W//2), 2C)
    """
    B, L, C = x.shape
    assert L == H * W, "input feature has wrong size"
    assert H % 2 == 0 and W % 2 == 0, "H and W must be even"
    H2, W2 = H // 2, W // 2
    C2, Cout = 2 * C, 2 * C
    BH2 = B * H2

    # Free (row-major) reshape: (B, H*W, C) -> (B*H2, 2, W2, 2C).
    #   [r, 0, w, :] = [x(2h, 2w)   | x(2h, 2w+1)]   = [x0 | x2]
    #   [r, 1, w, :] = [x(2h+1, 2w) | x(2h+1, 2w+1)] = [x1 | x3]
    x5 = x.reshape(BH2, 2, W2, C2)

    # One-time (tiny) parameter transform: permute the PyTorch [x0,x1,x2,x3]
    # channel order to the in-memory [x0,x2,x1,x3] order, fold gamma into the
    # reduction weight, and precompute the beta-induced output bias and the
    # per-output-column sum needed for the un-centered matmul.
    perm = jnp.array([0, 2, 1, 3], dtype=jnp.int32)
    gamma_p = gamma.astype(jnp.float32).reshape(4, C)[perm].reshape(4 * C, 1)
    beta_p = beta.astype(jnp.float32).reshape(4, C)[perm].reshape(4 * C)
    wt_p = (w_red.astype(jnp.float32).T
            .reshape(4, C, Cout)[perm].reshape(4 * C, Cout))
    wg = (gamma_p * wt_p).astype(x.dtype)                  # MXU operand dtype
    wsum = jnp.sum(wg.astype(jnp.float32), axis=0)         # (Cout,)
    bias = beta_p @ wt_p                                   # (Cout,)
    aux = jnp.stack([wsum, bias], axis=0)                  # (2, Cout) f32
    wg3 = wg.reshape(2, C2, Cout)

    itemsize = jnp.dtype(x.dtype).itemsize
    th = _pick_row_tile(BH2, W2, C, itemsize)
    grid = (BH2 // th,)
    n_rows = BH2 * W2

    est = (th * W2 * _per_token_vmem_bytes(C, itemsize)
           + _fixed_vmem_bytes(C, itemsize))
    # Clamp to a limit that is safe on every generation (v7x scoped default is
    # 32 MiB; the tile picker already keeps the estimate under ~24 MiB).
    vmem_bytes = int(min(max(est + (4 << 20), 16 << 20), 32 << 20))

    out = pl.pallas_call(
        partial(_patch_merging_kernel, eps=eps),
        out_shape=jax.ShapeDtypeStruct((n_rows, Cout), x.dtype),
        grid=grid,
        in_specs=[
            pl.BlockSpec((th, 2, W2, C2), lambda i: (i, 0, 0, 0)),
            pl.BlockSpec((2, Cout), lambda i: (0, 0)),
            pl.BlockSpec((2, C2, Cout), lambda i: (0, 0, 0)),
        ],
        out_specs=pl.BlockSpec((th * W2, Cout), lambda i: (i, 0)),
        compiler_params=pltpu.CompilerParams(
            dimension_semantics=("parallel",),
            vmem_limit_bytes=vmem_bytes,
        ),
    )(x5, aux, wg3)

    # Free reshape back to (B, num_merged_tokens, 2C).
    return out.reshape(B, H2 * W2, Cout)


def _patch_merging_ref(x, H, W, gamma, beta, w_red, eps=1e-5):
    """Pure-JAX reference mirroring the PyTorch module."""
    B, L, C = x.shape
    xi = x.reshape(B, H, W, C)
    x0 = xi[:, 0::2, 0::2, :]
    x1 = xi[:, 1::2, 0::2, :]
    x2 = xi[:, 0::2, 1::2, :]
    x3 = xi[:, 1::2, 1::2, :]
    xc = jnp.concatenate([x0, x1, x2, x3], axis=-1).reshape(B, -1, 4 * C)
    mu = jnp.mean(xc, axis=-1, keepdims=True)
    var = jnp.mean((xc - mu) ** 2, axis=-1, keepdims=True)
    xn = (xc - mu) * jax.lax.rsqrt(var + eps) * gamma + beta
    return jnp.einsum("btk,ok->bto", xn, w_red,
                      precision=jax.lax.Precision.HIGHEST)


if __name__ == "__main__":
    # Small shapes consistent with the module: x is (B, H*W, dim).
    B, H, W, dim = 2, 16, 16, 64
    N = H * W

    key = jax.random.PRNGKey(0)
    kx, kg, kb, kw = jax.random.split(key, 4)

    x = jax.random.normal(kx, (B, N, dim), dtype=jnp.float32)
    gamma = 1.0 + 0.1 * jax.random.normal(kg, (4 * dim,), dtype=jnp.float32)
    beta = 0.1 * jax.random.normal(kb, (4 * dim,), dtype=jnp.float32)
    # PyTorch nn.Linear(4*dim, 2*dim, bias=False).weight has shape (2*dim, 4*dim).
    w_red = 0.05 * jax.random.normal(kw, (2 * dim, 4 * dim), dtype=jnp.float32)

    out = patch_merging_pallas(x, H, W, gamma, beta, w_red)
    out = jax.block_until_ready(out)

    ref = _patch_merging_ref(x, H, W, gamma, beta, w_red)
    assert out.shape == (B, (H // 2) * (W // 2), 2 * dim)
    assert jnp.allclose(out, ref, atol=2e-3, rtol=2e-3), \
        float(jnp.max(jnp.abs(out - ref)))
    print("KERNEL_OK")
</pallas_src>

<mosaic_0001>
module attributes {stable_mosaic.version = 11 : i64} {
  func.func @_patch_merging_kernel(%arg0: i32, %arg1: memref<4x2x8x128xf32, #tpu.memory_space<vmem>>, %arg2: memref<2x128xf32, #tpu.memory_space<vmem>>, %arg3: memref<2x128x128xf32, #tpu.memory_space<vmem>>, %arg4: memref<32x128xf32, #tpu.memory_space<vmem>>) attributes {dimension_semantics = [#tpu.dimension_semantics<parallel>], iteration_bounds = array<i64: 4>, scalar_prefetch = 0 : i64, scratch_operands = 0 : i64, tpu.core_type = #tpu.core_type<tc>, window_params = [{transform_indices = @transform_0, window_bounds = array<i64: 4, 2, 8, 128>}, {pipeline_mode = #tpu.pipeline_mode<synchronous>, transform_indices = @transform_1, window_bounds = array<i64: 2, 128>}, {pipeline_mode = #tpu.pipeline_mode<synchronous>, transform_indices = @transform_2, window_bounds = array<i64: 2, 128, 128>}, {transform_indices = @transform_3, window_bounds = array<i64: 32, 128>}]} {
    %c0 = arith.constant 0 : index
    %c0_0 = arith.constant 0 : index
    %c0_1 = arith.constant 0 : index
    %c0_2 = arith.constant 0 : index
    %0 = vector.load %arg1[%c0, %c0_0, %c0_1, %c0_2] : memref<4x2x8x128xf32, #tpu.memory_space<vmem>>, vector<4x1x8x128xf32>
    %1 = vector.shape_cast %0 : vector<4x1x8x128xf32> to vector<4x8x128xf32>
    %2 = vector.shape_cast %1 : vector<4x8x128xf32> to vector<32x128xf32>
    %c0_3 = arith.constant 0 : index
    %c1 = arith.constant 1 : index
    %c0_4 = arith.constant 0 : index
    %c0_5 = arith.constant 0 : index
    %3 = vector.load %arg1[%c0_3, %c1, %c0_4, %c0_5] : memref<4x2x8x128xf32, #tpu.memory_space<vmem>>, vector<4x1x8x128xf32>
    %4 = vector.shape_cast %3 : vector<4x1x8x128xf32> to vector<4x8x128xf32>
    %5 = vector.shape_cast %4 : vector<4x8x128xf32> to vector<32x128xf32>
    %cst = arith.constant dense<0.000000e+00> : vector<32xf32>
    %6 = vector.multi_reduction <add>, %2, %cst [1] : vector<32x128xf32> to vector<32xf32>
    %7 = vector.shape_cast %6 : vector<32xf32> to vector<32x1xf32>
    %cst_6 = arith.constant dense<0.000000e+00> : vector<32xf32>
    %8 = vector.multi_reduction <add>, %5, %cst_6 [1] : vector<32x128xf32> to vector<32xf32>
    %9 = vector.shape_cast %8 : vector<32xf32> to vector<32x1xf32>
    %10 = arith.addf %7, %9 : vector<32x1xf32>
    %11 = arith.mulf %2, %2 : vector<32x128xf32>
    %cst_7 = arith.constant dense<0.000000e+00> : vector<32xf32>
    %12 = vector.multi_reduction <add>, %11, %cst_7 [1] : vector<32x128xf32> to vector<32xf32>
    %13 = vector.shape_cast %12 : vector<32xf32> to vector<32x1xf32>
    %14 = arith.mulf %5, %5 : vector<32x128xf32>
    %cst_8 = arith.constant dense<0.000000e+00> : vector<32xf32>
    %15 = vector.multi_reduction <add>, %14, %cst_8 [1] : vector<32x128xf32> to vector<32xf32>
    %16 = vector.shape_cast %15 : vector<32xf32> to vector<32x1xf32>
    %17 = arith.addf %13, %16 : vector<32x1xf32>
    %cst_9 = arith.constant 3.906250e-03 : f32
    %18 = vector.broadcast %cst_9 : f32 to vector<32x1xf32>
    %19 = arith.mulf %10, %18 : vector<32x1xf32>
    %cst_10 = arith.constant 3.906250e-03 : f32
    %20 = vector.broadcast %cst_10 : f32 to vector<32x1xf32>
    %21 = arith.mulf %17, %20 : vector<32x1xf32>
    %22 = arith.mulf %19, %19 : vector<32x1xf32>
    %23 = arith.subf %21, %22 : vector<32x1xf32>
    %cst_11 = arith.constant 0.000000e+00 : f32
    %24 = vector.broadcast %cst_11 : f32 to vector<32x1xf32>
    %25 = arith.maximumf %23, %24 : vector<32x1xf32>
    %cst_12 = arith.constant 9.99999974E-6 : f32
    %26 = vector.broadcast %cst_12 : f32 to vector<32x1xf32>
    %27 = arith.addf %25, %26 : vector<32x1xf32>
    %28 = math.rsqrt %27 : vector<32x1xf32>
    %c0_13 = arith.constant 0 : index
    %c0_14 = arith.constant 0 : index
    %c0_15 = arith.constant 0 : index
    %29 = vector.load %arg3[%c0_13, %c0_14, %c0_15] : memref<2x128x128xf32, #tpu.memory_space<vmem>>, vector<1x128x128xf32>
    %30 = vector.shape_cast %29 : vector<1x128x128xf32> to vector<128x128xf32>
    %cst_16 = arith.constant dense<0.000000e+00> : vector<32x128xf32>
    %31 = tpu.matmul %2, %30, %cst_16 {dimension_numbers = #tpu.dot_dimension_numbers<[1], [0], [0], [1], [0, 0, 1, 1], [], []>} : vector<32x128xf32>, vector<128x128xf32>, vector<32x128xf32> -> vector<32x128xf32>
    %c1_17 = arith.constant 1 : index
    %c0_18 = arith.constant 0 : index
    %c0_19 = arith.constant 0 : index
    %32 = vector.load %arg3[%c1_17, %c0_18, %c0_19] : memref<2x128x128xf32, #tpu.memory_space<vmem>>, vector<1x128x128xf32>
    %33 = vector.shape_cast %32 : vector<1x128x128xf32> to vector<128x128xf32>
    %cst_20 = arith.constant dense<0.000000e+00> : vector<32x128xf32>
    %34 = tpu.matmul %5, %33, %cst_20 {dimension_numbers = #tpu.dot_dimension_numbers<[1], [0], [0], [1], [0, 0, 1, 1], [], []>} : vector<32x128xf32>, vector<128x128xf32>, vector<32x128xf32> -> vector<32x128xf32>
    %35 = arith.addf %31, %34 : vector<32x128xf32>
    %c0_21 = arith.constant 0 : index
    %c0_22 = arith.constant 0 : index
    %36 = vector.load %arg2[%c0_21, %c0_22] : memref<2x128xf32, #tpu.memory_space<vmem>>, vector<1x128xf32>
    %c1_23 = arith.constant 1 : index
    %c0_24 = arith.constant 0 : index
    %37 = vector.load %arg2[%c1_23, %c0_24] : memref<2x128xf32, #tpu.memory_space<vmem>>, vector<1x128xf32>
    %38 = vector.broadcast %19 : vector<32x1xf32> to vector<32x128xf32>
    %39 = vector.broadcast %36 : vector<1x128xf32> to vector<32x128xf32>
    %40 = arith.mulf %38, %39 : vector<32x128xf32>
    %41 = arith.subf %35, %40 : vector<32x128xf32>
    %42 = vector.broadcast %28 : vector<32x1xf32> to vector<32x128xf32>
    %43 = arith.mulf %42, %41 : vector<32x128xf32>
    %44 = vector.broadcast %37 : vector<1x128xf32> to vector<32x128xf32>
    %45 = arith.addf %43, %44 : vector<32x128xf32>
    %c0_25 = arith.constant 0 : index
    %c0_26 = arith.constant 0 : index
    %46 = vector.load %arg4[%c0_25, %c0_26] : memref<32x128xf32, #tpu.memory_space<vmem>>, vector<32x128xf32>
    tpu.vector_store %arg4[%c0_25, %c0_26], %45 {strides = array<i32>} : memref<32x128xf32, #tpu.memory_space<vmem>>, vector<32x128xf32>,
    return
  }
  func.func @transform_0(%arg0: i32) -> (i32, i32, i32, i32) {
    %c0_i32 = arith.constant 0 : i32
    %c0_i32_0 = arith.constant 0 : i32
    %c0_i32_1 = arith.constant 0 : i32
    %c0_i32_2 = arith.constant 0 : i32
    return %arg0, %c0_i32, %c0_i32_0, %c0_i32_1 : i32, i32, i32, i32
  }
  func.func @transform_1(%arg0: i32) -> (i32, i32) {
    %c0_i32 = arith.constant 0 : i32
    %c0_i32_0 = arith.constant 0 : i32
    %c0_i32_1 = arith.constant 0 : i32
    return %c0_i32, %c0_i32_0 : i32, i32
  }
  func.func @transform_2(%arg0: i32) -> (i32, i32, i32) {
    %c0_i32 = arith.constant 0 : i32
    %c0_i32_0 = arith.constant 0 : i32
    %c0_i32_1 = arith.constant 0 : i32
    %c0_i32_2 = arith.constant 0 : i32
    return %c0_i32, %c0_i32_0, %c0_i32_1 : i32, i32, i32
  }
  func.func @transform_3(%arg0: i32) -> (i32, i32) {
    %c0_i32 = arith.constant 0 : i32
    %c0_i32_0 = arith.constant 0 : i32
    return %arg0, %c0_i32 : i32, i32
  }
}

</mosaic_0001>

<bundles_post_ra>
// kernel: tpu_custom_call.1
= control target key start
LH: loop header
LB: loop body
LE: loop exit
PB: predicated region body
PF: predicated region fallthrough
CT: control target
= control target key end

     0   :  { %8 = vsyncpa [#allocation3], 0  ;;  %s1251_s0 = inlined_call_operand.hbm [shape: f32[16,2,8,128], index: 0, kind: input, shape index: {}]   ;;  %s1252_s1 = inlined_call_operand.hbm [shape: f32[2,128], index: 1, kind: input, shape index: {}]   ;;  %s1253_s2 = inlined_call_operand.hbm [shape: f32[2,128,128], index: 2, kind: input, shape index: {}]   ;;  %s1254_s3 = inlined_call_operand.hbm [shape: f32[128,128], index: 3, kind: output, shape index: {}]  }
   0x1   :  { %10 = vsyncpa [#allocation3 + $0x1], 0 }
   0x2   :  { %11 = vsyncpa [#allocation6], 0 }
   0x3   :  { %12 = vsyncpa [#allocation4], 0 }
   0x4   :  { %14 = vsyncpa [#allocation4 + $0x1], 0  ;;  %s1044_s12 = smov 0   ;;  %s1046_s13 = smov 0  }
   0x5   :  { %s1048_s14 = smov 0   ;;  %s1050_s15 = smov 0  }
   0x6 LB: > { %s1065_s16 = sadd.s32 4294967295, %s1014_s15   ;;  %s643_s17 = sadd.s32 4294967294, %s1014_s15   ;;  %s1014_s15 = sphi %s1050_s15, %s1275_s15   ;;  %s1010_s14 = sphi %s1048_s14, %s1274_s14   ;;  %s1006_s13 = sphi %s1046_s13, %s1273_s13   ;;  %s1002_s12 = sphi %s1044_s12, %s1272_s12  }
   0x7   : > { %s1069_s18 = sadd.s32 1, %s1014_s15   ;;  %s27_s19 = sadd.s32 1, %s1010_s14 }
   0x8   : > { %s24_s20 = ssub.s32 %s1014_s15, %s1069_s18  ;;  %p34_p0 = scmp.ne.s32.totalorder %s1010_s14, %s1006_s13 }
   0x9   : > { %p25_p1 = scmp.eq.s32.totalorder %s24_s20, 0  ;;  %p35_p2 = scmp.eq.s32.totalorder %s1014_s15, 0 }
   0xa   : > { %p40_p3 = scmp.ne.s32.totalorder %s1006_s13, %s1002_s12  ;;  %p1255_p4 = scmp.eq.s32.totalorder %s1065_s16, 0 }
   0xb   : > { %s1081_s21 = scalar_select %p25_p1, %s1010_s14, %s27_s19  }
   0xc   : > { %p1083_p5 = por %p35_p2, %p34_p0  ;;  %p1089_p6 = por %p1255_p4, %p40_p3 }
   0xd   : > { %p106_p7 = scmp.eq.s32.totalorder %s1065_s16, 3  ;;  %p112_p8 = scmp.eq.s32.totalorder %s643_s17, 3 }
   0xe   : > { %s1260_s23 = scalar_select %p1089_p6, 1, 0 }
   0xf   : > { %p644_p9 = scmp.ge.s32.totalorder %s1014_s15, 1  ;;  %p119_p10 = scmp.lt.s32.totalorder %s1014_s15, 5 }
  0x10   : > { %p1096_p11 = por %p106_p7, %p34_p0  ;;  %p1100_p12 = por %p112_p8, %p40_p3 }
  0x11   : > { %p1104_p13 = pnand %p644_p9, %p119_p10  ;;  %s1016_s27 = smov [#allocation5]  }
  0x12   : > { %s1261_s24 = scalar_select %p1096_p11, 1, 0 }
  0x13   : > { %s1262_s25 = scalar_select %p1100_p12, 1, 0 }
  0x14   : > { %s1263_s26 = scalar_select %p1104_p13, 1, 0 }
  0x15   : > { %p799_p1 = pneg %p1104_p13  ;;  %s132_s28 = sshll.u32 %s1016_s27, 4  ;;  %s133_s28 = int_to_ptr.vmem [resolvable:$true] %s132_s28 }
  0x16   : > { %p816_p2 = scmp.lt.s32.totalorder %s1014_s15, 4  ;;  %s1017_s4 = smov [#allocation7]  }
  0x17   : > { %p1113_p0 = pnand %p799_p1, %p1255_p4  ;;  %s142_s5 = sshll.u32 %s1017_s4, 4  ;;  %s143_s5 = int_to_ptr.vmem [resolvable:$true] %s142_s5 }
  0x18   : > { %p1119_p3 = pnand %p816_p2, %p1083_p5  ;;  %s877_s6 = scalar_lea.vmem %s133_s28, 32 }
  0x19   : > { %p868_p7 = pneg %p1113_p0  ;;  %p878_p8 = scmp.ne.s32.totalorder %s133_s28, %s877_s6 }
  0x1a   : > { %p885_p1 = scmp.lt.s32.totalorder %s133_s28, %s133_s28  ;;  %p886_p4 = scmp.lt.s32.totalorder %s877_s6, %s877_s6 }
  0x1b   : > { %p880_p9 = pnand %p878_p8, %p868_p7 }
  0x1c   : > { %p887_p12 = por %p886_p4, %p885_p1 }
  0x1d   : > { %p881_p10 = pneg %p880_p9 }
  0x1f   : > { %p888_p11 = pnand %p887_p12, %p881_p10 }
  0x21   : > { %891 = shalt.err (!%p888_p11)
}
  0x22   : > { %802 = dma.hbm_to_vmem [thread:$0]  (!%p1113_p0), %s1252_s1, 32, %s133_s28, [#allocation6]  }
  0x23   : > { %s156_s9 = sand.u32 1, %s1010_s14   ;;  %s903_s10 = scalar_lea.vmem %s143_s5, 4096 }
  0x24   : > { %p904_p5 = scmp.ne.s32.totalorder %s143_s5, %s903_s10  ;;  %p911_p9 = scmp.lt.s32.totalorder %s143_s5, %s143_s5 }
  0x25   : > { %p912_p6 = scmp.lt.s32.totalorder %s903_s10, %s903_s10 }
  0x26   : > { %p906_p2 = pnand %p904_p5, %p868_p7 }
  0x27   : > { %p913_p4 = por %p912_p6, %p911_p9 }
  0x28   : > { %p907_p8 = pneg %p906_p2 }
  0x2a   : > { %p914_p12 = pnand %p913_p4, %p907_p8 }
  0x2c   : > { %917 = shalt.err (!%p914_p12)
}
  0x2d   : > { %s1018_s11 = smov 128   ;;  %s1019_s17 = smov 8  }
  0x2e   : > { %805 = dma.hbm_to_vmem [thread:$0]  (!%p1113_p0), %s1253_s2, 4096, %s143_s5, [#allocation6], %s1018_s11, %s1018_s11, %s1019_s17  }
  0x2f   : > { %s648_s22 = sshll.u32 %s156_s9, 6  ;;  %s669_s27 = sshll.u32 %s1014_s15, 10 }
  0x30   : > { %s1149_s6 = scalar_lea.hbm %s1251_s0, %s669_s27  ;;  %s160_s7 = scalar_lea.vmem [#allocation2], %s648_s22 }
  0x31   : > { %s168_s8 = sshll.u32 %s160_s7, 4  ;;  %s1153_s29 = scalar_lea.sflag [#allocation3], %s156_s9  ;;  %s1151_s8 = int_to_ptr.vmem [resolvable:$true] %s168_s8 }
  0x32   : > { %s918_s10 = scalar_lea.hbm %s1149_s6, 1024  ;;  %p920_p11 = pneg %p1119_p3 }
  0x33   : > { %p919_p6 = scmp.ne.s32.totalorder %s1149_s6, %s918_s10  ;;  %s923_s20 = scalar_lea.hbm %s1251_s0, 4096 }
  0x34   : > { %p924_p10 = scmp.lt.s32.totalorder %s1149_s6, %s1251_s0  ;;  %p925_p1 = scmp.lt.s32.totalorder %s923_s20, %s918_s10 }
  0x35   : > { %p921_p0 = pnand %p920_p11, %p919_p6 }
  0x36   : > { %p926_p5 = por %p925_p1, %p924_p10 }
  0x37   : > { %p922_p7 = pneg %p921_p0 }
  0x39   : > { %p927_p2 = pnand %p926_p5, %p922_p7 }
  0x3b   : > { %930 = shalt.err (!%p927_p2)
}
  0x3c   : > { %s931_s9 = scalar_lea.vmem %s1151_s8, 1024  ;;  %s1020_s22 = smov [#allocation2]  }
  0x3d   : > { %p932_p8 = scmp.ne.s32.totalorder %s1151_s8, %s931_s9  ;;  %s936_s4 = sshll.u32 %s1020_s22, 4  ;;  %s937_s4 = int_to_ptr.vmem [resolvable:$false] %s936_s4 }
  0x3e   : > { %s938_s7 = scalar_lea.vmem %s937_s4, 2048  ;;  %p939_p12 = scmp.lt.s32.totalorder %s1151_s8, %s937_s4 }
  0x3f   : > { %p934_p9 = pnand %p932_p8, %p920_p11  ;;  %p940_p6 = scmp.lt.s32.totalorder %s938_s7, %s931_s9 }
  0x41   : > { %p935_p4 = pneg %p934_p9  ;;  %p941_p0 = por %p940_p6, %p939_p12 }
  0x43   : > { %p942_p13 = pnand %p941_p0, %p935_p4 }
  0x45   : > { %945 = shalt.err (!%p942_p13)
}
  0x46   : > { %809 = dma.hbm_to_vmem [thread:$0]  (!%p1119_p3), %s1149_s6, 1024, %s1151_s8, %s1153_s29, %s1018_s11, %s1018_s11, %s1019_s17  }
  0x47   : > { %p1266_p11 = scmp.ne.s32.totalorder %s1263_s26, 0 }
  0x48   : > { %s1180_s10 = sand.u32 (!%p1266_p11), 1, %s1006_s13   ;;  %p1267_p13 = scmp.ne.s32.totalorder (!%p1266_p11), %s1260_s23, 0 }
  0x49   : > { %180 = sbr.rel (%p1266_p11) target bundleno = 341 (0x155), region = 32  ;;  %s653_s5 = sshll.u32 (!%p1266_p11), %s1180_s10, 6 }
  0x4a   : > { %s183_s19 = scalar_lea.sflag (!%p1266_p11), [#allocation3], %s1180_s10  ;;  %s1184_s20 = scalar_lea.vmem (!%p1266_p11), [#allocation2], %s653_s5 }
  0x4e   : > { %989 = dma.done.wait (%p1267_p13), %s183_s19, 1024  }
  0x4f   : > { %991 = vsyncadd (%p1267_p13), %s183_s19, 4294966272  ;;  %p1268_p3 = scmp.eq.s32.totalorder %s1065_s16, 0 }
  0x51   : > { %993 = dma.done.wait (%p1268_p3), [#allocation6], 4128   ;;  %p1269_p7 = pmov %p1268_p3 }
  0x52   : > { %v336_v0 = vld [vmem:[#allocation7 + $0xf8] sm:$0xff]  ;;  %v335_v2 = vld [vmem:[#allocation7 + $0xf0] sm:$0xff]  ;;  %v334_v4 = vld [vmem:[#allocation7 + $0xe8] sm:$0xff]  ;;  %s656_s23 = sshll.u32 %s1180_s10, 5  ;;  %s670_s11 = sshll.u32 %s1065_s16, 9 }
  0x53   : > { %995 = vsyncadd (%p1269_p7), [#allocation6], 4294963168  ;;  %v319_v1 = vld [vmem:[#allocation7 + $0x78] sm:$0xff]  ;;  %711 = vmatprep.subr.mxu0 %v336_v0  ;;  %v318_v3 = vld [vmem:[#allocation7 + $0x70] sm:$0xff]  ;;  %s216_s26 = scalar_lea.vmem [#allocation8], %s656_s23  ;;  %s1209_s8 = scalar_lea.hbm %s1254_s3, %s670_s11 }
  0x54   : > { %749 = vmatprep.subr.mxu1 %v319_v1  ;;  %712 = vmatpush3.msra.mxu0 %v336_v0  ;;  %v317_v5 = vld [vmem:[#allocation7 + $0x68] sm:$0xff]  ;;  %v333_v6 = vld [vmem:[#allocation7 + $0xe0] sm:$0xff]  ;;  %v332_v8 = vld [vmem:[#allocation7 + $0xd8] sm:$0xff]  ;;  %s551_s30 = sshll.u32 %s216_s26, 4  ;;  %s538_s29 = scalar_lea.sflag [#allocation4], %s1180_s10  ;;  %s1204_s30 = int_to_ptr.vmem [resolvable:$true] %s551_s30 }
  0x55   : > { %750 = vmatpush3.msra.mxu1 %v319_v1  ;;  %713 = vmatprep.subr.mxu0 %v335_v2  ;;  %v316_v7 = vld [vmem:[#allocation7 + $0x60] sm:$0xff]  ;;  %v315_v9 = vld [vmem:[#allocation7 + $0x58] sm:$0xff]  ;;  %v331_v10 = vld [vmem:[#allocation7 + $0xd0] sm:$0xff]  ;;  %s946_s27 = scalar_lea.vmem %s1204_s30, 512  ;;  %p1270_p1 = scmp.ne.s32.totalorder %s1261_s24, 0 }
  0x56   : > { %751 = vmatprep.subr.mxu1 %v318_v3  ;;  %714 = vmatpush3.msra.mxu0 %v335_v2  ;;  %v314_v11 = vld [vmem:[#allocation7 + $0x50] sm:$0xff]  ;;  %v330_v12 = vld [vmem:[#allocation7 + $0xc8] sm:$0xff]  ;;  %v329_v14 = vld [vmem:[#allocation7 + $0xc0] sm:$0xff]  ;;  %p947_p10 = scmp.ne.s32.totalorder %s1204_s30, %s946_s27  ;;  %s1021_s16 = smov [#allocation8]  }
  0x57   : > { %752 = vmatpush3.msra.mxu1 %v318_v3  ;;  %715 = vmatprep.subr.mxu0 %v334_v4  ;;  %v313_v13 = vld [vmem:[#allocation7 + $0x48] sm:$0xff]  ;;  %v312_v15 = vld [vmem:[#allocation7 + $0x40] sm:$0xff]  ;;  %v328_v16 = vld [vmem:[#allocation7 + $0xb8] sm:$0xff]  ;;  %s950_s28 = sshll.u32 %s1021_s16, 4  ;;  %s951_s28 = int_to_ptr.vmem [resolvable:$false] %s950_s28 }
  0x58   : > { %753 = vmatprep.subr.mxu1 %v317_v5  ;;  %716 = vmatpush3.msra.mxu0 %v334_v4  ;;  %v311_v17 = vld [vmem:[#allocation7 + $0x38] sm:$0xff]  ;;  %v327_v18 = vld [vmem:[#allocation7 + $0xb0] sm:$0xff]  ;;  %v326_v21 = vld [vmem:[#allocation7 + $0xa8] sm:$0xff]  ;;  %p948_p5 = pnand %p947_p10, %p1270_p1  ;;  %s952_s9 = scalar_lea.vmem %s951_s28, 1024 }
  0x59   : > { %754 = vmatpush3.msra.mxu1 %v317_v5  ;;  %717 = vmatprep.subr.mxu0 %v333_v6  ;;  %v310_v19 = vld [vmem:[#allocation7 + $0x30] sm:$0xff]  ;;  %v219_v20 = vld [vmem:[%s1184_s20] sm:$0xff]  ;;  %v309_v22 = vld [vmem:[#allocation7 + $0x28] sm:$0xff]  ;;  %p953_p8 = scmp.lt.s32.totalorder %s1204_s30, %s951_s28  ;;  %p954_p9 = scmp.lt.s32.totalorder %s952_s9, %s946_s27 }
  0x5a   : > { %755 = vmatprep.subr.mxu1 %v316_v7  ;;  %718 = vmatpush3.msra.mxu0 %v333_v6  ;;  %v325_v23 = vld [vmem:[#allocation7 + $0xa0] sm:$0xff]  ;;  %v220_v26 = vld [vmem:[%s1184_s20 + $0x10] sm:$0xff]  ;;  %v324_v27 = vld [vmem:[#allocation7 + $0x98] sm:$0xff]  ;;  %v248_v39 = vmul.f32 %v219_v20, %v219_v20  ;;  %p949_p2 = pneg %p948_p5 }
  0x5b   : > { %756 = vmatpush3.msra.mxu1 %v316_v7  ;;  %719 = vmatprep.subr.mxu0 %v332_v8  ;;  %v308_v24 = vld [vmem:[#allocation7 + $0x20] sm:$0xff]  ;;  %v307_v28 = vld [vmem:[#allocation7 + $0x18] sm:$0xff]  ;;  %v323_v29 = vld [vmem:[#allocation7 + $0x90] sm:$0xff]  ;;  %v249_v41 = vmul.f32 %v220_v26, %v220_v26  ;;  %p955_p4 = por %p954_p9, %p953_p8 }
  0x5c   : > { %757 = vmatprep.subr.mxu1 %v315_v9  ;;  %720 = vmatpush3.msra.mxu0 %v332_v8  ;;  %v221_v25 = vld [vmem:[%s1184_s20 + $0x20] sm:$0xff]  ;;  %v306_v30 = vld [vmem:[#allocation7 + $0x10] sm:$0xff]  ;;  %v657_v32 = vld [vmem:[%s1184_s20 + $0x8] sm:$0xff] }
  0x5d   : > { %758 = vmatpush3.msra.mxu1 %v315_v9  ;;  %721 = vmatprep.subr.mxu0 %v331_v10  ;;  %v222_v31 = vld [vmem:[%s1184_s20 + $0x30] sm:$0xff]  ;;  %v321_v35 = vld [vmem:[#allocation7 + $0x80] sm:$0xff]  ;;  %v658_v37 = vld [vmem:[%s1184_s20 + $0x18] sm:$0xff]  ;;  %v250_v42 = vmul.f32 %v221_v25, %v221_v25  ;;  %v260_v44 = vmul.f32 %v657_v32, %v657_v32  ;;  %p956_p12 = pnand %p955_p4, %p949_p2 }
  0x5e   : > { %759 = vmatprep.subr.mxu1 %v314_v11  ;;  %722 = vmatpush3.msra.mxu0 %v331_v10  ;;  %v322_v33 = vld [vmem:[#allocation7 + $0x88] sm:$0xff]  ;;  %v304_v36 = vld [vmem:[#allocation7] sm:$0xff]  ;;  %v660_v40 = vld [vmem:[%s1184_s20 + $0x38] sm:$0xff]  ;;  %v251_v43 = vmul.f32 %v222_v31, %v222_v31  ;;  %v261_v45 = vmul.f32 %v658_v37, %v658_v37 }
  0x5f   : > { %760 = vmatpush3.msra.mxu1 %v314_v11  ;;  %723 = vmatprep.subr.mxu0 %v330_v12  ;;  %v305_v34 = vld [vmem:[#allocation7 + $0x8] sm:$0xff]  ;;  %v263_v47 = vmul.f32 %v660_v40, %v660_v40 }
  0x60   : > { %761 = vmatprep.subr.mxu1 %v313_v13  ;;  %724 = vmatpush3.msra.mxu0 %v330_v12  ;;  %v659_v38 = vld [vmem:[%s1184_s20 + $0x28] sm:$0xff] }
  0x61   : > { %762 = vmatpush3.msra.mxu1 %v313_v13  ;;  %725 = vmatprep.subr.mxu0 %v329_v14  ;;  %v262_v46 = vmul.f32 %v659_v38, %v659_v38 }
  0x62   : > { %763 = vmatprep.subr.mxu1 %v312_v15  ;;  %726 = vmatpush3.msra.mxu0 %v329_v14 }
  0x63   : > { %764 = vmatpush3.msra.mxu1 %v312_v15  ;;  %727 = vmatprep.subr.mxu0 %v328_v16 }
  0x64   : > { %765 = vmatprep.subr.mxu1 %v311_v17  ;;  %728 = vmatpush3.msra.mxu0 %v328_v16 }
  0x65   : > { %766 = vmatpush3.msra.mxu1 %v311_v17  ;;  %729 = vmatprep.subr.mxu0 %v327_v18 }
  0x66   : > { %767 = vmatprep.subr.mxu1 %v310_v19  ;;  %730 = vmatpush3.msra.mxu0 %v327_v18 }
  0x67   : > { %768 = vmatpush3.msra.mxu1 %v310_v19  ;;  %228 = vadd.xlane.f32.xlu0 %v219_v20 }
  0x68   : > { %731 = vmatprep.subr.mxu0 %v326_v21  ;;  %769 = vmatprep.subr.mxu1 %v309_v22 }
  0x69   : > { %732 = vmatpush3.msra.mxu0 %v326_v21  ;;  %770 = vmatpush3.msra.mxu1 %v309_v22 }
  0x6a   : > { %733 = vmatprep.subr.mxu0 %v325_v23  ;;  %771 = vmatprep.subr.mxu1 %v308_v24 }
  0x6b   : > { %734 = vmatpush3.msra.mxu0 %v325_v23  ;;  %772 = vmatpush3.msra.mxu1 %v308_v24 }
  0x6c   : > { %232 = vadd.xlane.f32.xlu1 %v221_v25  ;;  %230 = vadd.xlane.f32.xlu0 %v220_v26 }
  0x6d   : > { %735 = vmatprep.subr.mxu0 %v324_v27  ;;  %773 = vmatprep.subr.mxu1 %v307_v28 }
  0x6e   : > { %736 = vmatpush3.msra.mxu0 %v324_v27  ;;  %774 = vmatpush3.msra.mxu1 %v307_v28 }
  0x6f   : > { %737 = vmatprep.subr.mxu0 %v323_v29  ;;  %775 = vmatprep.subr.mxu1 %v306_v30 }
  0x70   : > { %738 = vmatpush3.msra.mxu0 %v323_v29  ;;  %776 = vmatpush3.msra.mxu1 %v306_v30 }
  0x71   : > { %234 = vadd.xlane.f32.xlu1 %v222_v31  ;;  %236 = vadd.xlane.f32.xlu0 %v657_v32 }
  0x72   : > { %739 = vmatprep.subr.mxu0 %v322_v33  ;;  %777 = vmatprep.subr.mxu1 %v305_v34 }
  0x73   : > { %740 = vmatpush3.msra.mxu0 %v322_v33  ;;  %778 = vmatpush3.msra.mxu1 %v305_v34  ;;  %v661_v33 = vld [vmem:[#allocation5] ss:$0 sm:$0xff] }
  0x74   : > { %741 = vmatprep.subr.mxu0 %v321_v35  ;;  %779 = vmatprep.subr.mxu1 %v304_v36 }
  0x75   : > { %742 = vmatpush3.msra.mxu0 %v321_v35  ;;  %743 = vmatprep.mubr.f32.mxu0 %v657_v32 }
  0x76   : > { %780 = vmatpush3.msra.mxu1 %v304_v36  ;;  %238 = vadd.xlane.f32.xlu1 %v658_v37 }
  0x77   : > { %240 = vadd.xlane.f32.xlu0 %v659_v38  ;;  %781 = vmatprep.mubr.f32.mxu1 %v219_v20 }
  0x78   : > { %744 = vmatmul.mubr.f32.vlgmr.msra.gmra.mxu0 %v658_v37  ;;  %782 = vmatmul.mubr.f32.vlgmr.msra.gmra.mxu1 %v220_v26 }
  0x79   : > { %746 = vmatprep.mubr.f32.mxu0 %v659_v38  ;;  %784 = vmatprep.mubr.f32.mxu1 %v221_v25 }
  0x7a   : > { %242 = vadd.xlane.f32.xlu1 %v660_v40 }
  0x7b   : > { %252 = vadd.xlane.f32.xlu0 %v248_v39 }
  0x7c   : > { %747 = vmatmul.mubr.f32.gmra.mxu0 %v660_v40  ;;  %785 = vmatmul.mubr.f32.gmra.mxu1 %v222_v31 }
  0x7e   : > { %254 = vadd.xlane.f32.xlu1 %v249_v41 }
  0x7f   : > { %256 = vadd.xlane.f32.xlu0 %v250_v42 }
  0x82   : > { %258 = vadd.xlane.f32.xlu1 %v251_v43 }
  0x83   : > { %264 = vadd.xlane.f32.xlu0 %v260_v44  ;;  %v662_v44 = vld [vmem:[#allocation5 + $0x1] ss:$0 sm:$0xff] }
  0x86   : > { %266 = vadd.xlane.f32.xlu1 %v261_v45 }
  0x87   : > { %268 = vadd.xlane.f32.xlu0 %v262_v46 }
  0x8a   : > { %270 = vadd.xlane.f32.xlu1 %v263_v47 }
  0xf0   : > { %v229_v48 = vpop.xlane.xlu0 %228 }
  0xf5   : > { %v233_v49 = vpop.xlane.xlu1 %232  ;;  %v231_v51 = vpop.xlane.xlu0 %230 }
  0xfa   : > { %v235_v50 = vpop.xlane.xlu1 %234  ;;  %v237_v53 = vpop.xlane.xlu0 %236 }
  0xfb   : > { %v244_v63 = vadd.f32 %v237_v53, %v229_v48 }
  0xfd   : > { %v276_v4 = vmul.f32 0.00390625, %v244_v63 }
  0xff   : > { %v239_v52 = vpop.xlane.xlu1 %238  ;;  %v284_v12 = vmul.f32 %v276_v4, %v276_v4  ;;  %v513_v39 = vmul.f32 %v661_v33, %v276_v4 }
 0x100   : > { %v241_v55 = vpop.xlane.xlu0 %240  ;;  %v245_v61 = vadd.f32 %v239_v52, %v231_v51 }
 0x101   : > { %v246_v5 = vadd.f32 %v241_v55, %v233_v49 }
 0x102   : > { %v277_v0 = vmul.f32 0.00390625, %v245_v61 }
 0x103   : > { %v243_v54 = vpop.xlane.xlu1 %242  ;;  %v278_v13 = vmul.f32 0.00390625, %v246_v5 }
 0x104   : > { %v253_v57 = vpop.xlane.xlu0 %252  ;;  %v247_v1 = vadd.f32 %v243_v54, %v235_v50  ;;  %v285_v8 = vmul.f32 %v277_v0, %v277_v0  ;;  %v514_v35 = vmul.f32 %v661_v33, %v277_v0 }
 0x105   : > { %v286_v19 = vmul.f32 %v278_v13, %v278_v13  ;;  %v515_v52 = vmul.f32 %v661_v33, %v278_v13 }
 0x106   : > { %v279_v9 = vmul.f32 0.00390625, %v247_v1 }
 0x107   : > { %v255_v56 = vpop.xlane.xlu1 %254 }
 0x108   : > { %v257_v59 = vpop.xlane.xlu0 %256  ;;  %v287_v16 = vmul.f32 %v279_v9, %v279_v9  ;;  %v516_v46 = vmul.f32 %v661_v33, %v279_v9 }
 0x10b   : > { %v259_v58 = vpop.xlane.xlu1 %258 }
 0x10c   : > { %v265_v62 = vpop.xlane.xlu0 %264 }
 0x10d   : > { %v272_v6 = vadd.f32 %v265_v62, %v253_v57 }
 0x10f   : > { %v267_v60 = vpop.xlane.xlu1 %266  ;;  %v280_v14 = vmul.f32 0.00390625, %v272_v6 }
 0x110   : > { %v273_v2 = vadd.f32 %v267_v60, %v255_v56  ;;  %v269_v7 = vpop.xlane.xlu0 %268 }
 0x111   : > { %v274_v15 = vadd.f32 %v269_v7, %v257_v59  ;;  %v288_v20 = vsub.f32 %v280_v14, %v284_v12 }
 0x112   : > { %v281_v10 = vmul.f32 0.00390625, %v273_v2 }
 0x113   : > { %v271_v3 = vpop.xlane.xlu1 %270  ;;  %v282_v21 = vmul.f32 0.00390625, %v274_v15  ;;  %v292_v24 = vmax.f32 %v288_v20, 0.0 }
 0x114   : > { %v275_v11 = vadd.f32 %v271_v3, %v259_v58  ;;  %v289_v17 = vsub.f32 %v281_v10, %v285_v8 }
 0x115   : > { %v290_v25 = vsub.f32 %v282_v21, %v286_v19  ;;  %v296_v28 = vadd.f32 1e-05, %v292_v24 }
 0x116   : > { %v283_v18 = vmul.f32 0.00390625, %v275_v11  ;;  %v293_v22 = vmax.f32 %v289_v17, 0.0 }
 0x117   : > { %v294_v29 = vmax.f32 %v290_v25, 0.0 }
 0x118   : > { %v291_v23 = vsub.f32 %v283_v18, %v287_v16  ;;  %v297_v26 = vadd.f32 1e-05, %v293_v22 }
 0x119   : > { %v298_v31 = vadd.f32 1e-05, %v294_v29 }
 0x11a   : > { %v295_v27 = vmax.f32 %v291_v23, 0.0  ;;  %858 = vrsqrt.f32 %v297_v26 }
 0x11b   : > { %860 = vrsqrt.f32 %v296_v28 }
 0x11c   : > { %v299_v30 = vadd.f32 1e-05, %v295_v27 }
 0x11e   : > { %862 = vrsqrt.f32 %v299_v30 }
 0x11f   : > { %864 = vrsqrt.f32 %v298_v31 }
 0x127   : > { %v859_v43 = vpop.eup %858 }
 0x128   : > { %v861_v51 = vpop.eup %860 }
 0x12b   : > { %v863_v58 = vpop.eup %862 }
 0x12c   : > { %v865_v62 = vpop.eup %864 }
 0x138   : > { %v745_v32 = vpop.f32.mrf.mxu0  ;;  %v783_v34 = vpop.f32.mrf.mxu1 }
 0x139   : > { %v494_v36 = vadd.f32 %v783_v34, %v745_v32 }
 0x13a   : > { %v403_v37 = vpop.f32.mrf.mxu0  ;;  %v488_v38 = vpop.f32.mrf.mxu1 }
 0x13b   : > { %v518_v40 = vsub.f32 %v494_v36, %v514_v35  ;;  %v489_v41 = vadd.f32 %v488_v38, %v403_v37 }
 0x13c   : > { %v748_v42 = vpop.f32.mrf.mxu0  ;;  %v786_v45 = vpop.f32.mrf.mxu1 }
 0x13d   : > { %v522_v47 = vmul.f32 %v859_v43, %v518_v40  ;;  %v517_v48 = vsub.f32 %v489_v41, %v513_v39  ;;  %v504_v49 = vadd.f32 %v786_v45, %v748_v42 }
 0x13e   : > { %v413_v50 = vpop.f32.mrf.mxu0  ;;  %v498_v53 = vpop.f32.mrf.mxu1 }
 0x13f   : > { %v530_v54 = vadd.f32 %v662_v44, %v522_v47  ;;  %v521_v55 = vmul.f32 %v861_v51, %v517_v48  ;;  %v520_v56 = vsub.f32 %v504_v49, %v516_v46  ;;  %v499_v57 = vadd.f32 %v498_v53, %v413_v50 }
 0x141   : > { %534 = vst [vmem:[%s216_s26 + $0x8] sm:$0xff] %v530_v54  ;;  %v529_v59 = vadd.f32 %v662_v44, %v521_v55  ;;  %v524_v60 = vmul.f32 %v863_v58, %v520_v56  ;;  %v519_v61 = vsub.f32 %v499_v57, %v515_v52 }
 0x143   : > { %533 = vst [vmem:[%s216_s26] sm:$0xff] %v529_v59  ;;  %v532_v63 = vadd.f32 %v662_v44, %v524_v60  ;;  %v523_v0 = vmul.f32 %v865_v62, %v519_v61 }
 0x145   : > { %536 = vst [vmem:[%s216_s26 + $0x18] sm:$0xff] %v532_v63  ;;  %v531_v1 = vadd.f32 %v662_v44, %v523_v0 }
 0x147   : > { %535 = vst [vmem:[%s216_s26 + $0x10] sm:$0xff] %v531_v1 }
 0x148   : > { %959 = shalt.err (!%p956_p12)
}
 0x149   : > { %s960_s22 = scalar_lea.hbm %s1209_s8, 512  ;;  %s964_s5 = scalar_lea.hbm %s1254_s3, 2048 }
 0x14a   : > { %p961_p6 = scmp.ne.s32.totalorder %s1209_s8, %s960_s22  ;;  %p965_p13 = scmp.lt.s32.totalorder %s1209_s8, %s1254_s3 }
 0x14b   : > { %p966_p3 = scmp.lt.s32.totalorder %s964_s5, %s960_s22 }
 0x14c   : > { %p962_p0 = pnand %p961_p6, %p1270_p1 }
 0x14d   : > { %p967_p7 = por %p966_p3, %p965_p13 }
 0x14e   : > { %p963_p11 = pneg %p962_p0 }
 0x150   : > { %p968_p10 = pnand %p967_p7, %p963_p11 }
 0x152   : > { %971 = shalt.err (!%p968_p10)
}
 0x153   : > { %s1022_s23 = smov 128   ;;  %s1023_s26 = smov 8  }
 0x154   : > { %797 = dma.vmem_to_hbm [thread:$0]  (%p1270_p1), %s1204_s30, 512, %s1209_s8, %s538_s29, %s1022_s23, %s1022_s23, %s1023_s26  }
 0x155 PF: > { %p819_p5 = scmp.ge.s32.totalorder %s1014_s15, 2  ;;  %s566_s11 = sand.u32 1, %s1002_s12  }
 0x156   : > { %p1271_p2 = scmp.ne.s32.totalorder %s1262_s25, 0  ;;  %s567_s17 = scalar_lea.sflag [#allocation4], %s566_s11 }
 0x158   : > { %p811_p8 = pnand %p819_p5, %p1271_p2 }
 0x15a   : > { %p812_p9 = pneg %p811_p8 }
 0x15c   : > { %997 = dma.done.wait (%p812_p9), %s567_s17, 512  }
 0x15d   : > { %999 = vsyncadd (%p812_p9), %s567_s17, 4294966784  ;;  %p17_p4 = scmp.ge.s32.totalorder %s1069_s18, 6   ;;  %s1272_s12 = smov %s1006_s13 }
 0x15e   : > { %s1273_s13 = smov %s1010_s14  ;;  %s1274_s14 = smov %s1081_s21 }
 0x15f   : > { %s1275_s15 = smov %s1069_s18  ;;  %19 = sbr.rel (!%p17_p4) target bundleno = 6 (0x6), region = 87 }
 0x164   :  { %572 = vsyncpa [#allocation3], 1 }
 0x165   :  { %574 = vsyncpa [#allocation3 + $0x1], 1 }
 0x166   :  { %575 = vsyncpa [#allocation6], 1 }
 0x167   :  { %576 = vsyncpa [#allocation4], 1 }
 0x168   :  { %578 = vsyncpa [#allocation4 + $0x1], 1 }

</bundles_post_ra>
